<compile_context>
chip_gen: v6e
topology: v6e:2x2x1
jax: 0.10.0
libtpu: 0.0.40
codegen_flags: <defaults>
</compile_context>

<pallas_src>
import functools

import jax
import jax.numpy as jnp
from jax.experimental import pallas as pl
from jax.experimental.pallas import tpu as pltpu


def _round_up(x, m):
    return ((x + m - 1) // m) * m


def _pad_to(a, shape, dtype):
    """Zero-pad `a` to `shape` and cast to `dtype` (no-op if already there)."""
    a = a.astype(dtype)
    if tuple(a.shape) == tuple(shape):
        return a
    out = jnp.zeros(shape, dtype)
    return out.at[tuple(slice(0, s) for s in a.shape)].set(a)


def _mlp_kernel_simple(x_ref, w_ref, b_ref, o_ref):
    # Single-K-tile path: MXU matmul (bf16 in, f32 accumulate), bias + ReLU.
    y = jnp.dot(x_ref[...], w_ref[...], preferred_element_type=jnp.float32)
    y = y + b_ref[...]
    o_ref[...] = jnp.maximum(y, 0.0).astype(o_ref.dtype)


def _mlp_kernel_ksplit(x_ref, w_ref, b_ref, o_ref, acc_ref):
    # K-tiled path: accumulate partial products in an f32 VMEM scratch,
    # apply bias + ReLU and store only on the last K step.
    k = pl.program_id(2)

    @pl.when(k == 0)
    def _():
        acc_ref[...] = jnp.zeros_like(acc_ref)

    acc_ref[...] += jnp.dot(x_ref[...], w_ref[...],
                            preferred_element_type=jnp.float32)

    @pl.when(k == pl.num_programs(2) - 1)
    def _():
        y = acc_ref[...] + b_ref[...]
        o_ref[...] = jnp.maximum(y, 0.0).astype(o_ref.dtype)


@functools.partial(jax.jit,
                   static_argnames=("row_tile", "k_tile", "compute_dtype"))
def mlp_block_forward(x, w, b, *, row_tile=512, k_tile=2048,
                      compute_dtype=jnp.bfloat16):
    """relu(x @ w.T + b) via Pallas.

    x: [N, C_in]     float32
    w: [C_out, C_in] float32 (PyTorch nn.Linear layout)
    b: [C_out]       float32
    """
    n, c_in = x.shape
    c_out = w.shape[0]
    itemsize_c = jnp.dtype(compute_dtype).itemsize

    # ---- tiling / padding decisions (all static at trace time) -------------
    # Row tile: large (MXU/pipeline efficiency) but never bigger than needed.
    tile_m = min(row_tile, _round_up(n, 8))
    n_p = _round_up(n, tile_m)

    # K tile (C_in): lane-aligned; split only when C_in exceeds k_tile.
    c_in_p = _round_up(c_in, 128)
    tile_k = min(c_in_p, _round_up(k_tile, 128))
    c_in_p = _round_up(c_in_p, tile_k)

    # C_out tile: keep the resident weight block and the output tile within a
    # modest VMEM budget (double-buffered by the pipeline) so the kernel also
    # fits v7x's 64 MiB VMEM / v5e's 16 MiB default scoped limit.
    budget = 4 * 1024 * 1024
    max_tile_n_w = max(128, (budget // (tile_k * itemsize_c)) // 128 * 128)
    max_tile_n_o = max(128, (budget // (tile_m * 4)) // 128 * 128)
    tile_n = min(_round_up(c_out, 128), max_tile_n_w, max_tile_n_o)
    c_out_p = _round_up(c_out, tile_n)

    n_row_tiles = n_p // tile_m
    n_col_tiles = c_out_p // tile_n
    n_k_tiles = c_in_p // tile_k

    # ---- pad / cast inputs --------------------------------------------------
    x_p = _pad_to(x, (n_p, c_in_p), compute_dtype)
    w_t = _pad_to(w.T, (c_in_p, c_out_p), compute_dtype)
    b_p = _pad_to(b.reshape(1, -1), (1, c_out_p), jnp.float32)

    # Advisory cost estimate for XLA scheduling around the custom call.
    flops = 2 * n_p * c_in_p * c_out_p
    bytes_accessed = (n_p * c_in_p * itemsize_c          # x
                      + c_in_p * c_out_p * itemsize_c    # W
                      + c_out_p * 4                      # bias
                      + n_p * c_out_p * 4)               # out (f32)
    cost = pl.CostEstimate(flops=flops, transcendentals=0,
                           bytes_accessed=bytes_accessed)

    if n_k_tiles == 1:
        # Common case: whole K dimension resident; no accumulator needed.
        grid = (n_col_tiles, n_row_tiles)
        in_specs = [
            pl.BlockSpec((tile_m, tile_k), lambda j, i: (i, 0)),   # x rows
            pl.BlockSpec((tile_k, tile_n), lambda j, i: (0, j)),   # W cols
            pl.BlockSpec((1, tile_n), lambda j, i: (0, j)),        # bias
        ]
        out_specs = pl.BlockSpec((tile_m, tile_n), lambda j, i: (i, j))
        scratch_shapes = []
        kernel = _mlp_kernel_simple
        dim_sem = ("parallel", "parallel")
    else:
        # Large C_in: stream K tiles (innermost, "arbitrary") into an f32
        # accumulator; output tile written once on the final K step.
        grid = (n_col_tiles, n_row_tiles, n_k_tiles)
        in_specs = [
            pl.BlockSpec((tile_m, tile_k), lambda j, i, k: (i, k)),   # x
            pl.BlockSpec((tile_k, tile_n), lambda j, i, k: (k, j)),   # W
            pl.BlockSpec((1, tile_n), lambda j, i, k: (0, j)),        # bias
        ]
        out_specs = pl.BlockSpec((tile_m, tile_n), lambda j, i, k: (i, j))
        scratch_shapes = [pltpu.VMEM((tile_m, tile_n), jnp.float32)]
        kernel = _mlp_kernel_ksplit
        dim_sem = ("parallel", "parallel", "arbitrary")

    out_p = pl.pallas_call(
        kernel,
        out_shape=jax.ShapeDtypeStruct((n_p, c_out_p), x.dtype),
        grid_spec=pltpu.PrefetchScalarGridSpec(
            num_scalar_prefetch=0,
            grid=grid,
            in_specs=in_specs,
            out_specs=out_specs,
            scratch_shapes=scratch_shapes,
        ),
        compiler_params=pltpu.CompilerParams(
            dimension_semantics=dim_sem,
            vmem_limit_bytes=32 * 1024 * 1024,
        ),
        cost_estimate=cost,
    )(x_p, w_t, b_p)

    if (n_p, c_out_p) == (n, c_out):
        return out_p
    return out_p[:n, :c_out]


def init_mlp_block_params(key, in_channels, out_channels):
    """Matches MLPBlock.reset_parameters for the relu case:
    kaiming_normal_(weight, nonlinearity='relu') -> N(0, 2/fan_in); bias = 0."""
    std = (2.0 / in_channels) ** 0.5
    w = jax.random.normal(key, (out_channels, in_channels), jnp.float32) * std
    b = jnp.zeros((out_channels,), jnp.float32)
    return w, b


def _reference(x, w, b):
    # Reference with the same compute dtype (bf16-rounded inputs, f32 accum).
    x_c = x.astype(jnp.bfloat16).astype(jnp.float32)
    w_c = w.astype(jnp.bfloat16).astype(jnp.float32)
    return jnp.maximum(x_c @ w_c.T + b[None, :], 0.0)


# TODO(synk): the nn.LSTM submodule is constructed but never used in forward;
# BatchNorm1d / Dropout are disabled under the default ctor flags, so they are
# intentionally not implemented here.


if __name__ == "__main__":
    key = jax.random.PRNGKey(0)
    k_x1, k_w1, k_x2, k_w2 = jax.random.split(key, 4)

    # --- Test 1: small shapes; N not a multiple of the row tile and C_out not
    # a multiple of 128 to exercise padding/tail paths (single-K-tile path).
    N1, C_IN1, C_OUT1 = 50, 32, 64
    x1 = jax.random.normal(k_x1, (N1, C_IN1), jnp.float32)
    w1, b1 = init_mlp_block_params(k_w1, C_IN1, C_OUT1)
    out1 = jax.block_until_ready(mlp_block_forward(x1, w1, b1))
    ref1 = _reference(x1, w1, b1)
    assert out1.shape == (N1, C_OUT1)
    assert jnp.allclose(out1, ref1, atol=2e-3, rtol=2e-3), float(
        jnp.max(jnp.abs(out1 - ref1)))

    # --- Test 2: force the K-tiled accumulator path (C_in split over 3 tiles).
    N2, C_IN2, C_OUT2 = 40, 300, 96
    x2 = jax.random.normal(k_x2, (N2, C_IN2), jnp.float32)
    w2, b2 = init_mlp_block_params(k_w2, C_IN2, C_OUT2)
    out2 = jax.block_until_ready(mlp_block_forward(x2, w2, b2, k_tile=128))
    ref2 = _reference(x2, w2, b2)
    assert out2.shape == (N2, C_OUT2)
    assert jnp.allclose(out2, ref2, atol=3e-3, rtol=3e-3), float(
        jnp.max(jnp.abs(out2 - ref2)))

    print("KERNEL_OK")
</pallas_src>

<mosaic_0001>
module attributes {stable_mosaic.version = 11 : i64} {
  func.func @_mlp_kernel_simple(%arg0: i32, %arg1: i32, %arg2: memref<56x128xbf16, #tpu.memory_space<vmem>>, %arg3: memref<128x128xbf16, #tpu.memory_space<vmem>>, %arg4: memref<1x128xf32, #tpu.memory_space<vmem>>, %arg5: memref<56x128xf32, #tpu.memory_space<vmem>>) attributes {dimension_semantics = [#tpu.dimension_semantics<parallel>, #tpu.dimension_semantics<parallel>], iteration_bounds = array<i64: 1, 1>, scalar_prefetch = 0 : i64, scratch_operands = 0 : i64, tpu.core_type = #tpu.core_type<tc>, window_params = [{transform_indices = @transform_0, window_bounds = array<i64: 56, 128>}, {transform_indices = @transform_1, window_bounds = array<i64: 128, 128>}, {transform_indices = @transform_2, window_bounds = array<i64: 1, 128>}, {transform_indices = @transform_3, window_bounds = array<i64: 56, 128>}]} {
    %c0 = arith.constant 0 : index
    %c0_0 = arith.constant 0 : index
    %0 = vector.load %arg2[%c0, %c0_0] : memref<56x128xbf16, #tpu.memory_space<vmem>>, vector<56x128xbf16>
    %c0_1 = arith.constant 0 : index
    %c0_2 = arith.constant 0 : index
    %1 = vector.load %arg3[%c0_1, %c0_2] : memref<128x128xbf16, #tpu.memory_space<vmem>>, vector<128x128xbf16>
    %cst = arith.constant dense<0.000000e+00> : vector<56x128xf32>
    %2 = tpu.matmul %0, %1, %cst {dimension_numbers = #tpu.dot_dimension_numbers<[1], [0], [0], [1], [0, 0, 1, 1], [], []>} : vector<56x128xbf16>, vector<128x128xbf16>, vector<56x128xf32> -> vector<56x128xf32>
    %c0_3 = arith.constant 0 : index
    %c0_4 = arith.constant 0 : index
    %3 = vector.load %arg4[%c0_3, %c0_4] : memref<1x128xf32, #tpu.memory_space<vmem>>, vector<1x128xf32>
    %4 = vector.broadcast %3 : vector<1x128xf32> to vector<56x128xf32>
    %5 = arith.addf %2, %4 : vector<56x128xf32>
    %cst_5 = arith.constant 0.000000e+00 : f32
    %6 = vector.broadcast %cst_5 : f32 to vector<56x128xf32>
    %7 = arith.maximumf %5, %6 : vector<56x128xf32>
    %c0_6 = arith.constant 0 : index
    %c0_7 = arith.constant 0 : index
    %8 = vector.load %arg5[%c0_6, %c0_7] : memref<56x128xf32, #tpu.memory_space<vmem>>, vector<56x128xf32>
    tpu.vector_store %arg5[%c0_6, %c0_7], %7 {strides = array<i32>} : memref<56x128xf32, #tpu.memory_space<vmem>>, vector<56x128xf32>,
    return
  }
  func.func @transform_0(%arg0: i32, %arg1: i32) -> (i32, i32) {
    %c0_i32 = arith.constant 0 : i32
    %c0_i32_0 = arith.constant 0 : i32
    return %arg1, %c0_i32 : i32, i32
  }
  func.func @transform_1(%arg0: i32, %arg1: i32) -> (i32, i32) {
    %c0_i32 = arith.constant 0 : i32
    %c0_i32_0 = arith.constant 0 : i32
    return %c0_i32, %arg0 : i32, i32
  }
  func.func @transform_2(%arg0: i32, %arg1: i32) -> (i32, i32) {
    %c0_i32 = arith.constant 0 : i32
    %c0_i32_0 = arith.constant 0 : i32
    return %c0_i32, %arg0 : i32, i32
  }
  func.func @transform_3(%arg0: i32, %arg1: i32) -> (i32, i32) {
    %c0_i32 = arith.constant 0 : i32
    return %arg1, %arg0 : i32, i32
  }
}

</mosaic_0001>

<bundles_post_ra>
// kernel: mlp_block_forward.1
= control target key start
LH: loop header
LB: loop body
LE: loop exit
PB: predicated region body
PF: predicated region fallthrough
CT: control target
= control target key end

     0   :  { %s377_s0 = inlined_call_operand.vmem [shape: bf16[56,128], index: 0, kind: input, shape index: {}]   ;;  %s378_s1 = inlined_call_operand.vmem [shape: bf16[128,128], index: 1, kind: input, shape index: {}]   ;;  %s379_s2 = inlined_call_operand.vmem [shape: f32[1,128], index: 2, kind: input, shape index: {}]   ;;  %s380_s3 = inlined_call_operand.hbm [shape: f32[56,128], index: 3, kind: output, shape index: {}]  }
   0x1   :  { %v278_v0 = vld [vmem:[%s378_s1 + $0x38] sm:$0xff]   ;;  %v279_v1 = vld [vmem:[%s378_s1 + $0x30] sm:$0xff]   ;;  %v280_v2 = vld [vmem:[%s378_s1 + $0x28] sm:$0xff]  }
   0x2   :  { %235 = vmatprep.subr.bf16.mxu0 %v278_v0  ;;  %259 = vmatprep.subr.bf16.mxu1 %v278_v0  ;;  %v281_v3 = vld [vmem:[%s378_s1 + $0x20] sm:$0xff]   ;;  %v287_v5 = vld [vmem:[%s377_s0 + $0x10] sm:$0xff]  }
   0x3   :  { %236 = vmatpush3.bf16.msra.mxu0 %v278_v0  ;;  %267 = vmatpush3.bf16.msra.mxu1 %v278_v0  ;;  %v286_v4 = vld [vmem:[%s377_s0] sm:$0xff]  }
   0x4   :  { %237 = vmatprep.subr.bf16.mxu0 %v279_v1  ;;  %260 = vmatprep.subr.bf16.mxu1 %v279_v1 }
   0x5   :  { %251 = vmatprep.mubr.bf16.mxu0 %v286_v4 }
   0x7   :  { %238 = vmatpush3.bf16.msra.mxu0 %v279_v1  ;;  %268 = vmatpush3.bf16.msra.mxu1 %v279_v1 }
   0x8   :  { %239 = vmatprep.subr.bf16.mxu0 %v280_v2  ;;  %261 = vmatprep.subr.bf16.mxu1 %v280_v2 }
   0xb   :  { %240 = vmatpush3.bf16.msra.mxu0 %v280_v2  ;;  %269 = vmatpush3.bf16.msra.mxu1 %v280_v2 }
   0xc   :  { %8 = vsyncpa [#allocation3], 0  ;;  %241 = vmatprep.subr.bf16.mxu0 %v281_v3  ;;  %262 = vmatprep.subr.bf16.mxu1 %v281_v3  ;;  %v282_v6 = vld [vmem:[%s378_s1 + $0x18] sm:$0xff]   ;;  %v283_v7 = vld [vmem:[%s378_s1 + $0x10] sm:$0xff]  }
   0xd   :  { %255 = vmatprep.mubr.bf16.mxu1 %v287_v5  ;;  %v284_v8 = vld [vmem:[%s378_s1 + $0x8] sm:$0xff]   ;;  %v285_v9 = vld [vmem:[%s378_s1] sm:$0xff]   ;;  %v289_v11 = vld [vmem:[%s377_s0 + $0x18] ss:$0 sps:$4 sm:$0xff]  }
   0xe   :  { %v288_v10 = vld [vmem:[%s377_s0 + $0x8] sm:$0xff]   ;;  %v210_v12 = vld [vmem:[%s379_s2] ss:$0 sm:$0xff]  ;;  %s312_s0 = smov [#allocation2]  }
   0xf   :  { %242 = vmatpush3.bf16.msra.mxu0 %v281_v3  ;;  %270 = vmatpush3.bf16.msra.mxu1 %v281_v3  ;;  %s199_s1 = sshll.u32 %s312_s0, 4  ;;  %s200_s1 = int_to_ptr.vmem [resolvable:$true] %s199_s1 }
  0x10   :  { %243 = vmatprep.subr.bf16.mxu0 %v282_v6  ;;  %263 = vmatprep.subr.bf16.mxu1 %v282_v6  ;;  %s290_s2 = scalar_lea.vmem %s200_s1, 896  ;;  %p295_p1 = scmp.lt.s32.totalorder %s200_s1, %s200_s1 }
  0x11   :  { %p291_p0 = scmp.ne.s32.totalorder %s200_s1, %s290_s2  ;;  %p296_p2 = scmp.lt.s32.totalorder %s290_s2, %s290_s2 }
  0x13   :  { %244 = vmatpush3.bf16.msra.mxu0 %v282_v6  ;;  %271 = vmatpush3.bf16.msra.mxu1 %v282_v6  ;;  %p297_p3 = por %p296_p2, %p295_p1 }
  0x14   :  { %245 = vmatprep.subr.bf16.mxu0 %v283_v7  ;;  %264 = vmatprep.subr.bf16.mxu1 %v283_v7 }
  0x15   :  { %p298_p4 = pnand %p297_p3, %p291_p0 }
  0x17   :  { %246 = vmatpush3.bf16.msra.mxu0 %v283_v7  ;;  %272 = vmatpush3.bf16.msra.mxu1 %v283_v7 }
  0x18   :  { %247 = vmatprep.subr.bf16.mxu0 %v284_v8  ;;  %265 = vmatprep.subr.bf16.mxu1 %v284_v8 }
  0x1b   :  { %248 = vmatpush3.bf16.msra.mxu0 %v284_v8  ;;  %273 = vmatpush3.bf16.msra.mxu1 %v284_v8 }
  0x1c   :  { %249 = vmatprep.subr.bf16.mxu0 %v285_v9  ;;  %266 = vmatprep.subr.bf16.mxu1 %v285_v9 }
  0x1f   :  { %250 = vmatpush3.bf16.msra.mxu0 %v285_v9  ;;  %274 = vmatpush3.bf16.msra.mxu1 %v285_v9 }
  0x22   :  { %252 = vmatmul.mubr.bf16.vlgmr.msra.gmra.mxu0 %v288_v10  ;;  %256 = vmatmul.mubr.bf16.vlgmr.msra.gmra.mxu1 %v289_v11 }
  0xe2   :  { %v253_v13 = vpop.f32.mrf.mxu0  ;;  %v257_v14 = vpop.f32.mrf.mxu1 }
  0xe3   :  { %v159_v15 = vadd.f32 %v253_v13, %v210_v12  ;;  %v175_v16 = vadd.f32 %v257_v14, %v210_v12 }
  0xe4   :  { %v150_v17 = vpop.f32.mrf.mxu0  ;;  %v166_v18 = vpop.f32.mrf.mxu1 }
  0xe5   :  { %v182_v19 = vmax.f32 %v159_v15, 0.0  ;;  %v186_v20 = vmax.f32 %v175_v16, 0.0  ;;  %v151_v21 = vadd.f32 %v210_v12, %v150_v17  ;;  %v167_v22 = vadd.f32 %v210_v12, %v166_v18 }
  0xe6   :  { %v254_v23 = vpop.f32.mrf.mxu0  ;;  %v258_v24 = vpop.f32.mrf.mxu1 }
  0xe7   :  { %189 = vst [vmem:[#allocation2 + $0x10] sm:$0xff] %v182_v19  ;;  %193 = vst [vmem:[#allocation2 + $0x30] sm:$0xff] %v186_v20  ;;  %v180_v25 = vmax.f32 %v151_v21, 0.0  ;;  %v184_v26 = vmax.f32 %v167_v22, 0.0  ;;  %v162_v27 = vadd.f32 %v254_v23, %v210_v12 }
  0xe8   :  { %v153_v28 = vpop.f32.mrf.mxu0  ;;  %v169_v29 = vpop.f32.mrf.mxu1 }
  0xe9   :  { %187 = vst [vmem:[#allocation2] sm:$0xff] %v180_v25  ;;  %191 = vst [vmem:[#allocation2 + $0x20] sm:$0xff] %v184_v26  ;;  %v183_v30 = vmax.f32 %v162_v27, 0.0  ;;  %v154_v31 = vadd.f32 %v210_v12, %v153_v28  ;;  %v170_v32 = vadd.f32 %v210_v12, %v169_v29 }
  0xeb   :  { %190 = vst [vmem:[#allocation2 + $0x18] sm:$0xff] %v183_v30  ;;  %v181_v33 = vmax.f32 %v154_v31, 0.0  ;;  %v185_v34 = vmax.f32 %v170_v32, 0.0 }
  0xed   :  { %188 = vst [vmem:[#allocation2 + $0x8] sm:$0xff] %v181_v33  ;;  %192 = vst [vmem:[#allocation2 + $0x28] sm:$0xff] %v185_v34 }
  0xee   :  { %301 = shalt.err (!%p298_p4)
}
  0xef   :  { %s313_s11 = smov 128   ;;  %s314_s12 = smov 8  }
  0xf0   :  { %205 = dma.vmem_to_hbm [thread:$0]  %s200_s1, 896, %s380_s3, [#allocation3], %s313_s11, %s313_s11, %s314_s12  }
  0xf1   :  { %310 = dma.done.wait [#allocation3], 896  }
  0xf2   :  { %311 = vsyncadd [#allocation3], 4294966400 }
  0xf3   :  { %209 = vsyncpa [#allocation3], 1 }

</bundles_post_ra>
